<compile_context>
chip_gen: v7x
topology: tpu7x:2x2x1
jax: 0.10.0
libtpu: 0.0.40
codegen_flags: <defaults>
</compile_context>

<pallas_src>
import functools
import math

import jax
import jax.numpy as jnp
from jax.experimental import pallas as pl
from jax.experimental.pallas import tpu as pltpu


# --------------------------- kernel 1: QKV proj ----------------------------
def qkv_proj_kernel(x_ref, wqkv_ref, bqkv_ref, q_ref, k_ref, v_ref, *, n_head):
    C = x_ref.shape[2]
    hd = C // n_head

    x = x_ref[0].astype(jnp.bfloat16)                       # (TM, C)
    qkv = jnp.dot(x, wqkv_ref[...],                         # bf16 MXU, f32 acc
                  preferred_element_type=jnp.float32) + bqkv_ref[...]
    qkv = qkv.astype(jnp.bfloat16)                          # (TM, 3C)

    # layout plumbing only: write each head's columns into head-major outputs
    for h in range(n_head):
        q_ref[0, h] = qkv[:, h * hd:(h + 1) * hd]
        k_ref[0, h] = qkv[:, C + h * hd:C + (h + 1) * hd]
        v_ref[0, h] = qkv[:, 2 * C + h * hd:2 * C + (h + 1) * hd]


# ------------------ kernel 2: flash attention + c_proj ----------------------
def flash_attn_kernel(q_ref, k_ref, v_ref, wproj_ref, bproj_ref, o_ref,
                      m_sc, l_sc, acc_sc, *, tq, tk, n_head):
    qi = pl.program_id(1)
    ki = pl.program_id(2)
    nk = pl.num_programs(2)
    hd = acc_sc.shape[-1]
    C = wproj_ref.shape[-1]

    @pl.when(ki == 0)
    def _init():
        m_sc[...] = jnp.full(m_sc.shape, -jnp.inf, jnp.float32)
        l_sc[...] = jnp.zeros(l_sc.shape, jnp.float32)
        acc_sc[...] = jnp.zeros(acc_sc.shape, jnp.float32)

    # skip KV tiles that are entirely above the causal diagonal
    @pl.when(ki * tk < (qi + 1) * tq)
    def _compute():
        q = q_ref[0]                                         # (H, TQ, hd) bf16, pre-scaled
        k = k_ref[0]                                         # (H, TK, hd) bf16
        v = v_ref[0]                                         # (H, TK, hd) bf16

        # heads batched in one contraction (no per-head loop, no .T)
        s = jnp.einsum("hqd,hkd->hqk", q, k,
                       preferred_element_type=jnp.float32)   # (H, TQ, TK) f32

        def update(s_val):
            m_prev = m_sc[...]
            m_new = jnp.maximum(m_prev, s_val.max(axis=-1, keepdims=True))
            alpha = jnp.exp(m_prev - m_new)
            p = jnp.exp(s_val - m_new)
            l_sc[...] = alpha * l_sc[...] + p.sum(axis=-1, keepdims=True)
            acc_sc[...] = alpha * acc_sc[...] + jnp.einsum(
                "hqk,hkd->hqd", p.astype(v.dtype), v,
                preferred_element_type=jnp.float32)
            m_sc[...] = m_new

        # only tiles that touch the diagonal pay for the mask (built once,
        # broadcast over heads)
        needs_mask = (ki * tk + tk - 1) > (qi * tq)

        @pl.when(needs_mask)
        def _masked():
            row = jax.lax.broadcasted_iota(jnp.int32, (tq, tk), 0) + qi * tq
            col = jax.lax.broadcasted_iota(jnp.int32, (tq, tk), 1) + ki * tk
            update(jnp.where((col <= row)[None, :, :], s, -1e30))

        @pl.when(jnp.logical_not(needs_mask))
        def _unmasked():
            update(s)

    @pl.when(ki == nk - 1)
    def _finalize():
        inv_l = pl.reciprocal(l_sc[...], approx=True)        # EUP
        o_hm = (acc_sc[...] * inv_l).astype(jnp.bfloat16)    # (H, TQ, hd)
        # fused output projection: y = concat_h(o_h) @ Wproj
        #                            = sum_h o_h @ Wproj[h*hd:(h+1)*hd, :]
        y = jnp.zeros((tq, C), jnp.float32)
        for h in range(n_head):
            y = y + jnp.dot(o_hm[h], wproj_ref[h * hd:(h + 1) * hd, :],
                            preferred_element_type=jnp.float32)
        o_ref[0] = (y + bproj_ref[...]).astype(o_ref.dtype)


# ------------------------------ python wrapper ------------------------------
def causal_self_attention(x, wqkv, bqkv, wproj, bproj, *, n_head,
                          block_q=128, block_k=128, block_m=128):
    B, T, C = x.shape
    assert C % n_head == 0
    hd = C // n_head
    tm = min(block_m, T)
    tq = min(block_q, T)
    tk = min(block_k, T)
    assert T % tm == 0 and T % tq == 0 and T % tk == 0

    # Fold softmax scale into the q projection (zero runtime cost).
    scale = 1.0 / math.sqrt(hd)
    wqkv = wqkv.at[:, :C].multiply(scale)
    bqkv = bqkv.at[:, :C].multiply(scale)

    # bf16 weights halve HBM/VMEM traffic and run the MXU at full rate;
    # biases / accumulators / softmax stats stay f32.
    wqkv_bf = wqkv.astype(jnp.bfloat16)
    wproj_bf = wproj.astype(jnp.bfloat16)
    bqkv_f32 = bqkv.astype(jnp.float32)
    bproj_f32 = bproj.astype(jnp.float32)

    # ---- kernel 1: QKV projection, head-major (B, H, T, hd) outputs ----
    q_hm, k_hm, v_hm = pl.pallas_call(
        functools.partial(qkv_proj_kernel, n_head=n_head),
        grid=(B, T // tm),
        in_specs=[
            pl.BlockSpec((1, tm, C), lambda b, i: (b, i, 0)),
            pl.BlockSpec((C, 3 * C), lambda b, i: (0, 0)),
            pl.BlockSpec((1, 3 * C), lambda b, i: (0, 0)),
        ],
        out_specs=[
            pl.BlockSpec((1, n_head, tm, hd), lambda b, i: (b, 0, i, 0)),
            pl.BlockSpec((1, n_head, tm, hd), lambda b, i: (b, 0, i, 0)),
            pl.BlockSpec((1, n_head, tm, hd), lambda b, i: (b, 0, i, 0)),
        ],
        out_shape=[jax.ShapeDtypeStruct((B, n_head, T, hd), jnp.bfloat16)] * 3,
        compiler_params=pltpu.CompilerParams(
            dimension_semantics=("parallel", "parallel")),
    )(x, wqkv_bf, bqkv_f32)

    # ---- kernel 2: flash attention with fused output projection ----
    def q_index_map(b, qi, ki):
        return (b, 0, qi, 0)

    def kv_index_map(b, qi, ki):
        # clamp skipped (fully-masked) KV tiles to the last needed tile so the
        # pipeline does not issue useless DMAs for them
        last_needed = ((qi + 1) * tq - 1) // tk
        return (b, 0, jnp.minimum(ki, last_needed), 0)

    y = pl.pallas_call(
        functools.partial(flash_attn_kernel, tq=tq, tk=tk, n_head=n_head),
        grid=(B, T // tq, T // tk),
        in_specs=[
            pl.BlockSpec((1, n_head, tq, hd), q_index_map),
            pl.BlockSpec((1, n_head, tk, hd), kv_index_map),
            pl.BlockSpec((1, n_head, tk, hd), kv_index_map),
            pl.BlockSpec((C, C), lambda b, qi, ki: (0, 0)),
            pl.BlockSpec((1, C), lambda b, qi, ki: (0, 0)),
        ],
        out_specs=pl.BlockSpec((1, tq, C), lambda b, qi, ki: (b, qi, 0)),
        out_shape=jax.ShapeDtypeStruct((B, T, C), x.dtype),
        scratch_shapes=[
            pltpu.VMEM((n_head, tq, 1), jnp.float32),   # running max  m
            pltpu.VMEM((n_head, tq, 1), jnp.float32),   # running sum  l
            pltpu.VMEM((n_head, tq, hd), jnp.float32),  # output accumulator
        ],
        compiler_params=pltpu.CompilerParams(
            dimension_semantics=("parallel", "parallel", "arbitrary")),
    )(q_hm, k_hm, v_hm, wproj_bf, bproj_f32)
    return y


# --------------------------- pure-JAX reference -----------------------------
def causal_self_attention_ref(x, wqkv, bqkv, wproj, bproj, *, n_head):
    B, T, C = x.shape
    hd = C // n_head
    qkv = x @ wqkv + bqkv[0]
    q, k, v = qkv[..., :C], qkv[..., C:2 * C], qkv[..., 2 * C:]
    q = q.reshape(B, T, n_head, hd).transpose(0, 2, 1, 3)
    k = k.reshape(B, T, n_head, hd).transpose(0, 2, 1, 3)
    v = v.reshape(B, T, n_head, hd).transpose(0, 2, 1, 3)
    s = jnp.einsum("bhtd,bhsd->bhts", q, k) / math.sqrt(hd)
    mask = jnp.tril(jnp.ones((T, T), dtype=bool))
    s = jnp.where(mask, s, -jnp.inf)
    p = jax.nn.softmax(s, axis=-1)
    y = jnp.einsum("bhts,bhsd->bhtd", p, v)
    y = y.transpose(0, 2, 1, 3).reshape(B, T, C)
    return y @ wproj + bproj[0]


# ---------------------------------- main ------------------------------------
if __name__ == "__main__":
    B, T, C, N_HEAD = 2, 16, 32, 4   # small shapes; tq=tk=8 exercises tiling,
                                     # masked/unmasked tiles and causal skip

    key = jax.random.PRNGKey(0)
    k1, k2, k3, k4, k5 = jax.random.split(key, 5)
    wqkv = 0.02 * jax.random.normal(k1, (C, 3 * C), jnp.float32)   # c_attn W (in,out)
    bqkv = 0.02 * jax.random.normal(k2, (1, 3 * C), jnp.float32)   # c_attn b
    wproj = 0.02 * jax.random.normal(k3, (C, C), jnp.float32)      # c_proj W (in,out)
    bproj = 0.02 * jax.random.normal(k4, (1, C), jnp.float32)      # c_proj b
    x = jax.random.normal(k5, (B, T, C), jnp.float32)

    out = causal_self_attention(x, wqkv, bqkv, wproj, bproj, n_head=N_HEAD,
                                block_q=8, block_k=8, block_m=8)
    out = jax.block_until_ready(out)

    ref = causal_self_attention_ref(x, wqkv, bqkv, wproj, bproj, n_head=N_HEAD)
    assert out.shape == (B, T, C)
    # bf16 matmul inputs (f32 accumulation) -> compare with loosened tolerance
    max_err = float(jnp.max(jnp.abs(out - ref)))
    assert jnp.allclose(out, ref, rtol=2e-2, atol=1e-2), f"mismatch: {max_err}"

    print("KERNEL_OK")
</pallas_src>

<mosaic_0001>
module attributes {stable_mosaic.version = 11 : i64} {
  func.func @qkv_proj_kernel(%arg0: i32, %arg1: i32, %arg2: memref<1x8x32xf32, #tpu.memory_space<vmem>>, %arg3: memref<32x96xbf16, #tpu.memory_space<vmem>>, %arg4: memref<1x96xf32, #tpu.memory_space<vmem>>, %arg5: memref<1x4x8x8xbf16, #tpu.memory_space<vmem>>, %arg6: memref<1x4x8x8xbf16, #tpu.memory_space<vmem>>, %arg7: memref<1x4x8x8xbf16, #tpu.memory_space<vmem>>) attributes {dimension_semantics = [#tpu.dimension_semantics<parallel>, #tpu.dimension_semantics<parallel>], iteration_bounds = array<i64: 2, 2>, scalar_prefetch = 0 : i64, scratch_operands = 0 : i64, tpu.core_type = #tpu.core_type<tc>, window_params = [{transform_indices = @transform_0, window_bounds = array<i64: 1, 8, 32>}, {pipeline_mode = #tpu.pipeline_mode<synchronous>, transform_indices = @transform_1, window_bounds = array<i64: 32, 96>}, {pipeline_mode = #tpu.pipeline_mode<synchronous>, transform_indices = @transform_2, window_bounds = array<i64: 1, 96>}, {transform_indices = @transform_3, window_bounds = array<i64: 1, 4, 8, 8>}, {transform_indices = @transform_4, window_bounds = array<i64: 1, 4, 8, 8>}, {transform_indices = @transform_5, window_bounds = array<i64: 1, 4, 8, 8>}]} {
    %c0 = arith.constant 0 : index
    %c0_0 = arith.constant 0 : index
    %c0_1 = arith.constant 0 : index
    %0 = vector.load %arg2[%c0, %c0_0, %c0_1] : memref<1x8x32xf32, #tpu.memory_space<vmem>>, vector<1x8x32xf32>
    %1 = vector.shape_cast %0 : vector<1x8x32xf32> to vector<8x32xf32>
    %2 = arith.truncf %1 : vector<8x32xf32> to vector<8x32xbf16>
    %c0_2 = arith.constant 0 : index
    %c0_3 = arith.constant 0 : index
    %3 = vector.load %arg3[%c0_2, %c0_3] : memref<32x96xbf16, #tpu.memory_space<vmem>>, vector<32x96xbf16>
    %cst = arith.constant dense<0.000000e+00> : vector<8x96xf32>
    %4 = tpu.matmul %2, %3, %cst {dimension_numbers = #tpu.dot_dimension_numbers<[1], [0], [0], [1], [0, 0, 1, 1], [], []>} : vector<8x32xbf16>, vector<32x96xbf16>, vector<8x96xf32> -> vector<8x96xf32>
    %c0_4 = arith.constant 0 : index
    %c0_5 = arith.constant 0 : index
    %5 = vector.load %arg4[%c0_4, %c0_5] : memref<1x96xf32, #tpu.memory_space<vmem>>, vector<1x96xf32>
    %6 = vector.broadcast %5 : vector<1x96xf32> to vector<8x96xf32>
    %7 = arith.addf %4, %6 : vector<8x96xf32>
    %8 = arith.truncf %7 : vector<8x96xf32> to vector<8x96xbf16>
    %9 = vector.extract_strided_slice %8 {offsets = [0, 0], sizes = [8, 8], strides = [1, 1]} : vector<8x96xbf16> to vector<8x8xbf16>
    %c0_6 = arith.constant 0 : index
    %c0_7 = arith.constant 0 : index
    %c0_8 = arith.constant 0 : index
    %c0_9 = arith.constant 0 : index
    %10 = vector.load %arg5[%c0_6, %c0_7, %c0_8, %c0_9] : memref<1x4x8x8xbf16, #tpu.memory_space<vmem>>, vector<1x1x8x8xbf16>
    %11 = vector.shape_cast %10 : vector<1x1x8x8xbf16> to vector<8x8xbf16>
    %12 = vector.shape_cast %9 : vector<8x8xbf16> to vector<1x1x8x8xbf16>
    tpu.vector_store %arg5[%c0_6, %c0_7, %c0_8, %c0_9], %12 {strides = array<i32>} : memref<1x4x8x8xbf16, #tpu.memory_space<vmem>>, vector<1x1x8x8xbf16>,
    %13 = vector.extract_strided_slice %8 {offsets = [0, 32], sizes = [8, 8], strides = [1, 1]} : vector<8x96xbf16> to vector<8x8xbf16>
    %c0_10 = arith.constant 0 : index
    %c0_11 = arith.constant 0 : index
    %c0_12 = arith.constant 0 : index
    %c0_13 = arith.constant 0 : index
    %14 = vector.load %arg6[%c0_10, %c0_11, %c0_12, %c0_13] : memref<1x4x8x8xbf16, #tpu.memory_space<vmem>>, vector<1x1x8x8xbf16>
    %15 = vector.shape_cast %14 : vector<1x1x8x8xbf16> to vector<8x8xbf16>
    %16 = vector.shape_cast %13 : vector<8x8xbf16> to vector<1x1x8x8xbf16>
    tpu.vector_store %arg6[%c0_10, %c0_11, %c0_12, %c0_13], %16 {strides = array<i32>} : memref<1x4x8x8xbf16, #tpu.memory_space<vmem>>, vector<1x1x8x8xbf16>,
    %17 = vector.extract_strided_slice %8 {offsets = [0, 64], sizes = [8, 8], strides = [1, 1]} : vector<8x96xbf16> to vector<8x8xbf16>
    %c0_14 = arith.constant 0 : index
    %c0_15 = arith.constant 0 : index
    %c0_16 = arith.constant 0 : index
    %c0_17 = arith.constant 0 : index
    %18 = vector.load %arg7[%c0_14, %c0_15, %c0_16, %c0_17] : memref<1x4x8x8xbf16, #tpu.memory_space<vmem>>, vector<1x1x8x8xbf16>
    %19 = vector.shape_cast %18 : vector<1x1x8x8xbf16> to vector<8x8xbf16>
    %20 = vector.shape_cast %17 : vector<8x8xbf16> to vector<1x1x8x8xbf16>
    tpu.vector_store %arg7[%c0_14, %c0_15, %c0_16, %c0_17], %20 {strides = array<i32>} : memref<1x4x8x8xbf16, #tpu.memory_space<vmem>>, vector<1x1x8x8xbf16>,
    %21 = vector.extract_strided_slice %8 {offsets = [0, 8], sizes = [8, 8], strides = [1, 1]} : vector<8x96xbf16> to vector<8x8xbf16>
    %c0_18 = arith.constant 0 : index
    %c1 = arith.constant 1 : index
    %c0_19 = arith.constant 0 : index
    %c0_20 = arith.constant 0 : index
    %22 = vector.load %arg5[%c0_18, %c1, %c0_19, %c0_20] : memref<1x4x8x8xbf16, #tpu.memory_space<vmem>>, vector<1x1x8x8xbf16>
    %23 = vector.shape_cast %22 : vector<1x1x8x8xbf16> to vector<8x8xbf16>
    %24 = vector.shape_cast %21 : vector<8x8xbf16> to vector<1x1x8x8xbf16>
    tpu.vector_store %arg5[%c0_18, %c1, %c0_19, %c0_20], %24 {strides = array<i32>} : memref<1x4x8x8xbf16, #tpu.memory_space<vmem>>, vector<1x1x8x8xbf16>,
    %25 = vector.extract_strided_slice %8 {offsets = [0, 40], sizes = [8, 8], strides = [1, 1]} : vector<8x96xbf16> to vector<8x8xbf16>
    %c0_21 = arith.constant 0 : index
    %c1_22 = arith.constant 1 : index
    %c0_23 = arith.constant 0 : index
    %c0_24 = arith.constant 0 : index
    %26 = vector.load %arg6[%c0_21, %c1_22, %c0_23, %c0_24] : memref<1x4x8x8xbf16, #tpu.memory_space<vmem>>, vector<1x1x8x8xbf16>
    %27 = vector.shape_cast %26 : vector<1x1x8x8xbf16> to vector<8x8xbf16>
    %28 = vector.shape_cast %25 : vector<8x8xbf16> to vector<1x1x8x8xbf16>
    tpu.vector_store %arg6[%c0_21, %c1_22, %c0_23, %c0_24], %28 {strides = array<i32>} : memref<1x4x8x8xbf16, #tpu.memory_space<vmem>>, vector<1x1x8x8xbf16>,
    %29 = vector.extract_strided_slice %8 {offsets = [0, 72], sizes = [8, 8], strides = [1, 1]} : vector<8x96xbf16> to vector<8x8xbf16>
    %c0_25 = arith.constant 0 : index
    %c1_26 = arith.constant 1 : index
    %c0_27 = arith.constant 0 : index
    %c0_28 = arith.constant 0 : index
    %30 = vector.load %arg7[%c0_25, %c1_26, %c0_27, %c0_28] : memref<1x4x8x8xbf16, #tpu.memory_space<vmem>>, vector<1x1x8x8xbf16>
    %31 = vector.shape_cast %30 : vector<1x1x8x8xbf16> to vector<8x8xbf16>
    %32 = vector.shape_cast %29 : vector<8x8xbf16> to vector<1x1x8x8xbf16>
    tpu.vector_store %arg7[%c0_25, %c1_26, %c0_27, %c0_28], %32 {strides = array<i32>} : memref<1x4x8x8xbf16, #tpu.memory_space<vmem>>, vector<1x1x8x8xbf16>,
    %33 = vector.extract_strided_slice %8 {offsets = [0, 16], sizes = [8, 8], strides = [1, 1]} : vector<8x96xbf16> to vector<8x8xbf16>
    %c0_29 = arith.constant 0 : index
    %c2 = arith.constant 2 : index
    %c0_30 = arith.constant 0 : index
    %c0_31 = arith.constant 0 : index
    %34 = vector.load %arg5[%c0_29, %c2, %c0_30, %c0_31] : memref<1x4x8x8xbf16, #tpu.memory_space<vmem>>, vector<1x1x8x8xbf16>
    %35 = vector.shape_cast %34 : vector<1x1x8x8xbf16> to vector<8x8xbf16>
    %36 = vector.shape_cast %33 : vector<8x8xbf16> to vector<1x1x8x8xbf16>
    tpu.vector_store %arg5[%c0_29, %c2, %c0_30, %c0_31], %36 {strides = array<i32>} : memref<1x4x8x8xbf16, #tpu.memory_space<vmem>>, vector<1x1x8x8xbf16>,
    %37 = vector.extract_strided_slice %8 {offsets = [0, 48], sizes = [8, 8], strides = [1, 1]} : vector<8x96xbf16> to vector<8x8xbf16>
    %c0_32 = arith.constant 0 : index
    %c2_33 = arith.constant 2 : index
    %c0_34 = arith.constant 0 : index
    %c0_35 = arith.constant 0 : index
    %38 = vector.load %arg6[%c0_32, %c2_33, %c0_34, %c0_35] : memref<1x4x8x8xbf16, #tpu.memory_space<vmem>>, vector<1x1x8x8xbf16>
    %39 = vector.shape_cast %38 : vector<1x1x8x8xbf16> to vector<8x8xbf16>
    %40 = vector.shape_cast %37 : vector<8x8xbf16> to vector<1x1x8x8xbf16>
    tpu.vector_store %arg6[%c0_32, %c2_33, %c0_34, %c0_35], %40 {strides = array<i32>} : memref<1x4x8x8xbf16, #tpu.memory_space<vmem>>, vector<1x1x8x8xbf16>,
    %41 = vector.extract_strided_slice %8 {offsets = [0, 80], sizes = [8, 8], strides = [1, 1]} : vector<8x96xbf16> to vector<8x8xbf16>
    %c0_36 = arith.constant 0 : index
    %c2_37 = arith.constant 2 : index
    %c0_38 = arith.constant 0 : index
    %c0_39 = arith.constant 0 : index
    %42 = vector.load %arg7[%c0_36, %c2_37, %c0_38, %c0_39] : memref<1x4x8x8xbf16, #tpu.memory_space<vmem>>, vector<1x1x8x8xbf16>
    %43 = vector.shape_cast %42 : vector<1x1x8x8xbf16> to vector<8x8xbf16>
    %44 = vector.shape_cast %41 : vector<8x8xbf16> to vector<1x1x8x8xbf16>
    tpu.vector_store %arg7[%c0_36, %c2_37, %c0_38, %c0_39], %44 {strides = array<i32>} : memref<1x4x8x8xbf16, #tpu.memory_space<vmem>>, vector<1x1x8x8xbf16>,
    %45 = vector.extract_strided_slice %8 {offsets = [0, 24], sizes = [8, 8], strides = [1, 1]} : vector<8x96xbf16> to vector<8x8xbf16>
    %c0_40 = arith.constant 0 : index
    %c3 = arith.constant 3 : index
    %c0_41 = arith.constant 0 : index
    %c0_42 = arith.constant 0 : index
    %46 = vector.load %arg5[%c0_40, %c3, %c0_41, %c0_42] : memref<1x4x8x8xbf16, #tpu.memory_space<vmem>>, vector<1x1x8x8xbf16>
    %47 = vector.shape_cast %46 : vector<1x1x8x8xbf16> to vector<8x8xbf16>
    %48 = vector.shape_cast %45 : vector<8x8xbf16> to vector<1x1x8x8xbf16>
    tpu.vector_store %arg5[%c0_40, %c3, %c0_41, %c0_42], %48 {strides = array<i32>} : memref<1x4x8x8xbf16, #tpu.memory_space<vmem>>, vector<1x1x8x8xbf16>,
    %49 = vector.extract_strided_slice %8 {offsets = [0, 56], sizes = [8, 8], strides = [1, 1]} : vector<8x96xbf16> to vector<8x8xbf16>
    %c0_43 = arith.constant 0 : index
    %c3_44 = arith.constant 3 : index
    %c0_45 = arith.constant 0 : index
    %c0_46 = arith.constant 0 : index
    %50 = vector.load %arg6[%c0_43, %c3_44, %c0_45, %c0_46] : memref<1x4x8x8xbf16, #tpu.memory_space<vmem>>, vector<1x1x8x8xbf16>
    %51 = vector.shape_cast %50 : vector<1x1x8x8xbf16> to vector<8x8xbf16>
    %52 = vector.shape_cast %49 : vector<8x8xbf16> to vector<1x1x8x8xbf16>
    tpu.vector_store %arg6[%c0_43, %c3_44, %c0_45, %c0_46], %52 {strides = array<i32>} : memref<1x4x8x8xbf16, #tpu.memory_space<vmem>>, vector<1x1x8x8xbf16>,
    %53 = vector.extract_strided_slice %8 {offsets = [0, 88], sizes = [8, 8], strides = [1, 1]} : vector<8x96xbf16> to vector<8x8xbf16>
    %c0_47 = arith.constant 0 : index
    %c3_48 = arith.constant 3 : index
    %c0_49 = arith.constant 0 : index
    %c0_50 = arith.constant 0 : index
    %54 = vector.load %arg7[%c0_47, %c3_48, %c0_49, %c0_50] : memref<1x4x8x8xbf16, #tpu.memory_space<vmem>>, vector<1x1x8x8xbf16>
    %55 = vector.shape_cast %54 : vector<1x1x8x8xbf16> to vector<8x8xbf16>
    %56 = vector.shape_cast %53 : vector<8x8xbf16> to vector<1x1x8x8xbf16>
    tpu.vector_store %arg7[%c0_47, %c3_48, %c0_49, %c0_50], %56 {strides = array<i32>} : memref<1x4x8x8xbf16, #tpu.memory_space<vmem>>, vector<1x1x8x8xbf16>,
    return
  }
  func.func @transform_0(%arg0: i32, %arg1: i32) -> (i32, i32, i32) {
    %c0_i32 = arith.constant 0 : i32
    %c0_i32_0 = arith.constant 0 : i32
    return %arg0, %arg1, %c0_i32 : i32, i32, i32
  }
  func.func @transform_1(%arg0: i32, %arg1: i32) -> (i32, i32) {
    %c0_i32 = arith.constant 0 : i32
    %c0_i32_0 = arith.constant 0 : i32
    %c0_i32_1 = arith.constant 0 : i32
    return %c0_i32, %c0_i32_0 : i32, i32
  }
  func.func @transform_2(%arg0: i32, %arg1: i32) -> (i32, i32) {
    %c0_i32 = arith.constant 0 : i32
    %c0_i32_0 = arith.constant 0 : i32
    %c0_i32_1 = arith.constant 0 : i32
    return %c0_i32, %c0_i32_0 : i32, i32
  }
  func.func @transform_3(%arg0: i32, %arg1: i32) -> (i32, i32, i32, i32) {
    %c0_i32 = arith.constant 0 : i32
    %c0_i32_0 = arith.constant 0 : i32
    %c0_i32_1 = arith.constant 0 : i32
    return %arg0, %c0_i32, %arg1, %c0_i32_0 : i32, i32, i32, i32
  }
  func.func @transform_4(%arg0: i32, %arg1: i32) -> (i32, i32, i32, i32) {
    %c0_i32 = arith.constant 0 : i32
    %c0_i32_0 = arith.constant 0 : i32
    %c0_i32_1 = arith.constant 0 : i32
    return %arg0, %c0_i32, %arg1, %c0_i32_0 : i32, i32, i32, i32
  }
  func.func @transform_5(%arg0: i32, %arg1: i32) -> (i32, i32, i32, i32) {
    %c0_i32 = arith.constant 0 : i32
    %c0_i32_0 = arith.constant 0 : i32
    %c0_i32_1 = arith.constant 0 : i32
    return %arg0, %c0_i32, %arg1, %c0_i32_0 : i32, i32, i32, i32
  }
}

</mosaic_0001>

<bundles_post_ra>
// kernel: tpu_custom_call.1
= control target key start
LH: loop header
LB: loop body
LE: loop exit
PB: predicated region body
PF: predicated region fallthrough
CT: control target
= control target key end

     0   :  { %s1335_s0 = inlined_call_operand.hbm [shape: f32[2,16,32], index: 0, kind: input, shape index: {}]   ;;  %s1336_s1 = inlined_call_operand.hbm [shape: bf16[32,96], index: 1, kind: input, shape index: {}]   ;;  %s1337_s2 = inlined_call_operand.vmem [shape: f32[1,96], index: 2, kind: input, shape index: {}]   ;;  %s1338_s3 = inlined_call_operand.vmem [shape: bf16[2,4,16,8], index: 3, kind: output, shape index: {0}]   ;;  %s1339_s4 = inlined_call_operand.vmem [shape: bf16[2,4,16,8], index: 4, kind: output, shape index: {1}]   ;;  %s1340_s5 = inlined_call_operand.vmem [shape: bf16[2,4,16,8], index: 5, kind: output, shape index: {2}]  }
   0x1   :  { %1346 = sst [smem:[#allocation12_spill]] %s1336_s1 }
   0x2   :  { %1347 = sst [smem:[#allocation13_spill]] %s1339_s4 }
   0x3   :  { %1348 = sst [smem:[#allocation14_spill]] %s1340_s5 }
   0x4   :  { %11 = vsyncpa [#allocation3], 0 }
   0x5   :  { %13 = vsyncpa [#allocation3 + $0x1], 0 }
   0x6   :  { %14 = vsyncpa [#allocation5], 0  ;;  %s1075_s18 = smov 0   ;;  %s1077_s19 = smov 0  }
   0x7   :  { %s1079_s20 = smov 0   ;;  %s1081_s21 = smov 0  }
   0x8   :  { %s1083_s22 = smov 0   ;;  %s1085_s23 = smov 0  }
   0x9   :  { %s1087_s24 = smov 0   ;;  %s1089_s25 = smov 0  }
   0xa LB: > { %s748_s26 = sadd.s32 4294967295, %s1026_s25   ;;  %p54_p0 = scmp.ne.s32.totalorder %s1002_s19, %s998_s18  ;;  %s1026_s25 = sphi %s1089_s25, %s20_s25   ;;  %s1022_s24 = sphi %s1087_s24, %s1370_s24   ;;  %s1018_s23 = sphi %s1085_s23, %s1369_s23   ;;  %s1014_s22 = sphi %s1083_s22, %s1368_s22   ;;  %s1010_s21 = sphi %s1081_s21, %s1367_s21   ;;  %s1006_s20 = sphi %s1079_s20, %s1366_s20   ;;  %s1002_s19 = sphi %s1077_s19, %s1365_s19   ;;  %s998_s18 = sphi %s1075_s18, %s1364_s18  }
   0xb   : > { %p1117_p1 = scmp.eq.s32.totalorder %s748_s26, 0  ;;  %p750_p2 = scmp.ge.s32.totalorder %s1026_s25, 1 }
   0xc   : > { %p191_p3 = scmp.lt.s32.totalorder %s1026_s25, 5  ;;  %s1028_s30 = smov [#allocation4]  }
   0xd   : > { %s1349_s27 = scalar_select %p1117_p1, 1, 0 }
   0xe   : > { %p1125_p4 = por %p1117_p1, %p54_p0  ;;  %p1129_p5 = pnand %p750_p2, %p191_p3 }
   0xf   : > { %s203_s6 = sshll.u32 %s1028_s30, 4  ;;  %s1353_s1 = sld [smem:[#allocation12_spill]]  ;;  %s204_s6 = int_to_ptr.vmem [resolvable:$true] %s203_s6 }
  0x10   : > { %s1350_s28 = scalar_select %p1125_p4, 1, 0 }
  0x11   : > { %s1351_s29 = scalar_select %p1129_p5, 1, 0 }
  0x12   : > { %p805_p6 = pneg %p1129_p5 }
  0x14   : > { %p1137_p7 = pnand %p805_p6, %p1117_p1 }
  0x15   : > { %s898_s10 = scalar_lea.hbm %s1353_s1, 256 }
  0x16   : > { %p899_p8 = scmp.ne.s32.totalorder %s1353_s1, %s898_s10  ;;  %p900_p9 = pneg %p1137_p7 }
  0x17   : > { %p905_p12 = scmp.lt.u32.totalorder %s898_s10, %s1353_s1 }
  0x18   : > { %p901_p10 = pnand %p900_p9, %p899_p8 }
  0x1a   : > { %p902_p11 = pneg %p901_p10 }
  0x1c   : > { %p907_p13 = pnand %p905_p12, %p902_p11 }
  0x1e   : > { %910 = shalt.err (!%p907_p13)
}
  0x1f   : > { %s911_s15 = scalar_lea.vmem %s204_s6, 256  ;;  %p919_p6 = scmp.lt.s32.totalorder %s204_s6, %s204_s6 }
  0x20   : > { %p912_p0 = scmp.ne.s32.totalorder %s204_s6, %s911_s15  ;;  %p920_p1 = scmp.lt.s32.totalorder %s911_s15, %s911_s15 }
  0x22   : > { %p914_p2 = pnand %p912_p0, %p900_p9  ;;  %p921_p4 = por %p920_p1, %p919_p6 }
  0x24   : > { %p915_p3 = pneg %p914_p2 }
  0x26   : > { %p922_p5 = pnand %p921_p4, %p915_p3 }
  0x28   : > { %925 = shalt.err (!%p922_p5)
}
  0x29   : > { %s1029_s16 = smov 64   ;;  %s1030_s17 = smov 4  }
  0x2a   : > { %808 = dma.hbm_to_vmem [thread:$0]  (!%p1137_p7), %s1353_s1, 256, %s204_s6, [#allocation5], %s1029_s16, %s1029_s16, %s1030_s17  }
  0x2b   : > { %p122_p1 = scmp.eq.s32.totalorder %s748_s26, 3  ;;  %s29_s8 = sadd.s32 1, %s1018_s23 }
  0x2c   : > { %p30_p4 = scmp.ge.s32.totalorder %s29_s8, 2  ;;  %s32_s9 = sadd.s32 1, %s1022_s24 }
  0x2d   : > { %p48_p5 = scmp.ne.s32.totalorder %s1006_s20, %s1002_s19  ;;  %p49_p8 = scmp.eq.s32.totalorder %s1026_s25, 0 }
  0x2e   : > { %s1372_s8 = smov (%p30_p4, %s29_s8), 0  ;;  %s1374_s9 = smov (!%p30_p4, %s32_s9), %s1022_s24 }
  0x2f   : > { %1354 = sst [smem:[#allocation11_spill]] %s1372_s8  ;;  %s37_s7 = ssub.s32 %s1018_s23, %s1372_s8 }
  0x30   : > { %s41_s10 = sadd.s32 1, %s1006_s20  ;;  %p34_p9 = scmp.ge.s32.totalorder %s1374_s9, 2 }
  0x31   : > { %p1170_p7 = por %p122_p1, %p48_p5  ;;  %p1174_p10 = por %p49_p8, %p48_p5 }
  0x32   : > { %s220_s11 = sand.u32 1, %s1006_s20   ;;  %s1376_s9 = smov (%p34_p9, %s1374_s9), 0 }
  0x33   : > { %p814_p11 = scmp.lt.s32.totalorder %s1026_s25, 4  ;;  %s753_s12 = sshll.u32 %s220_s11, 3 }
  0x34   : > { %s36_s13 = ssub.s32 %s1022_s24, %s1376_s9  ;;  %s754_s15 = sshll.u32 %s1022_s24, 1 }
  0x35   : > { %s38_s14 = sor.u32 %s37_s7, %s36_s13  ;;  %s229_s16 = sadd.s32 %s1018_s23, %s754_s15 }
  0x36   : > { %p39_p12 = scmp.eq.s32.totalorder %s38_s14, 0  ;;  %s755_s17 = sshll.u32 %s229_s16, 7 }
  0x37   : > { %s224_s18 = scalar_lea.vmem [#allocation2], %s753_s12  ;;  %s1192_s4 = scalar_lea.hbm %s1335_s0, %s755_s17 }
  0x38   : > { %s233_s30 = sshll.u32 %s224_s18, 4  ;;  %p1200_p13 = pnand %p814_p11, %p1174_p10  ;;  %s1194_s30 = int_to_ptr.vmem [resolvable:$true] %s233_s30 }
  0x39   : > { %s1187_s1 = scalar_select %p39_p12, %s1006_s20, %s41_s10  }
  0x3a   : > { %s221_s10 = scalar_lea.sflag [#allocation3], %s220_s11  ;;  %s926_s12 = scalar_lea.hbm %s1192_s4, 128 }
  0x3b   : > { %p927_p0 = scmp.ne.s32.totalorder %s1192_s4, %s926_s12  ;;  %p928_p2 = pneg %p1200_p13 }
  0x3c   : > { %s931_s26 = scalar_lea.hbm %s1335_s0, 512  ;;  %p932_p1 = scmp.lt.u32.totalorder %s1192_s4, %s1335_s0 }
  0x3d   : > { %p929_p3 = pnand %p928_p2, %p927_p0  ;;  %p933_p4 = scmp.lt.u32.totalorder %s931_s26, %s926_s12 }
  0x3e   : > { %p935_p8 = scmp.lt.u32.totalorder %s926_s12, %s1192_s4 }
  0x3f   : > { %p930_p6 = pneg %p929_p3  ;;  %p934_p5 = por %p933_p4, %p932_p1 }
  0x41   : > { %p936_p9 = por %p935_p8, %p934_p5 }
  0x43   : > { %p937_p10 = pnand %p936_p9, %p930_p6 }
  0x45   : > { %940 = shalt.err (!%p937_p10)
}
  0x46   : > { %s941_s11 = scalar_lea.vmem %s1194_s30, 128  ;;  %s1031_s15 = smov [#allocation2]  }
  0x47   : > { %p942_p11 = scmp.ne.s32.totalorder %s1194_s30, %s941_s11  ;;  %s946_s16 = sshll.u32 %s1031_s15, 4  ;;  %s947_s16 = int_to_ptr.vmem [resolvable:$false] %s946_s16 }
  0x48   : > { %s948_s17 = scalar_lea.vmem %s947_s16, 256  ;;  %p949_p3 = scmp.lt.s32.totalorder %s1194_s30, %s947_s16 }
  0x49   : > { %p944_p12 = pnand %p942_p11, %p928_p2  ;;  %p950_p1 = scmp.lt.s32.totalorder %s948_s17, %s941_s11 }
  0x4b   : > { %p945_p0 = pneg %p944_p12  ;;  %p951_p4 = por %p950_p1, %p949_p3 }
  0x4d   : > { %p952_p5 = pnand %p951_p4, %p945_p0 }
  0x4f   : > { %955 = shalt.err (!%p952_p5)
}
  0x50   : > { %812 = dma.hbm_to_vmem [thread:$0]  (!%p1200_p13), %s1192_s4, 128, %s1194_s30, %s221_s10  }
  0x51   : > { %p1358_p6 = scmp.ne.s32.totalorder %s1351_s29, 0 }
  0x52   : > { %s244_s18 = sand.u32 (!%p1358_p6), 1, %s1002_s19   ;;  %p1359_p2 = scmp.ne.s32.totalorder (!%p1358_p6), %s1350_s28, 0 }
  0x53   : > { %242 = sbr.rel (%p1358_p6) target bundleno = 479 (0x1df), region = 32  ;;  %s757_s12 = sshll.u32 (!%p1358_p6), %s244_s18, 3 }
  0x54   : > { %s245_s5 = scalar_lea.sflag (!%p1358_p6), [#allocation3], %s244_s18  ;;  %s248_s8 = scalar_lea.vmem (!%p1358_p6), [#allocation2], %s757_s12 }
  0x5a   : > { %989 = dma.done.wait (%p1359_p2), %s245_s5, 128  }
  0x5b   : > { %991 = vsyncadd (%p1359_p2), %s245_s5, 4294967168  ;;  %p1360_p8 = scmp.ne.s32.totalorder %s1349_s27, 0 }
  0x5d   : > { %993 = dma.done.wait (%p1360_p8), [#allocation5], 256  }
  0x5e   : > { %995 = vsyncadd (%p1360_p8), [#allocation5], 4294967040  ;;  %v1032_v0 = vmov 0.0   ;;  %vm1033_vm0 = vmmov 0   ;;  %v896_v1 = vld [vmem:[#allocation4] sm:$0xff]   ;;  %v897_v2 = vld [vmem:[#allocation4 + $0x8] sm:$0xff]  }
  0x5f   : > { %791 = vmatprep.subr.bf16.mxu0 %v1032_v0  ;;  %795 = vmatprep.mubr.msk.bf16.mxu0 %vm1033_vm0, %v1032_v0  ;;  %v287_v3 = vld [vmem:[%s248_s8] sm:$0xff]  ;;  %vm312_vm1 = vcmask 261120   ;;  %s1243_s29 = sshll.u32 %s244_s18, 4  ;;  %vm357_vm2 = vcmask 60416   ;;  %s1034_s27 = smov 120  }
  0x60   : > { %792 = vmatpush3.bf16.msra.mxu0 %v896_v1  ;;  %v288_v4 = vpack.c.bf16 %v287_v3, %v287_v3  ;;  %v762_v5 = vld [vmem:[%s1337_s2] ss:$0 sm:$0xff]  ;;  %s1035_s30 = smov 96   ;;  %s1246_s7 = scalar_lea.vmem [#allocation6], %s1243_s29 }
  0x61   : > { %793 = vmatprep.subr.bf16.mxu0 %v1032_v0  ;;  %s1036_s10 = smov 88   ;;  %s1037_s26 = smov 64  }
  0x62   : > { %s1038_s13 = smov 112   ;;  %s1039_s14 = smov 56  }
  0x63   : > { %s1040_s11 = smov 48   ;;  %s1041_s15 = smov 80  }
  0x64   : > { %794 = vmatpush3.bf16.msra.mxu0 %v897_v2  ;;  %s1042_s16 = smov 72   ;;  %s1043_s17 = smov 104  }
  0x65   : > { %s1044_s18 = smov 40   ;;  %s1253_s12 = scalar_lea.vmem [#allocation7], %s1243_s29 }
  0x66   : > { %s1260_s5 = scalar_lea.vmem [#allocation8], %s1243_s29  ;;  %s779_s8 = sshll.u32 (%p1170_p7), %s1014_s22, 3 }
  0x67   : > { %796 = vmatmul.mubr.msk.bf16.vlgmr.msra.gmra.mrb[0].mxu0 %vm312_vm1, %v288_v4  ;;  %s431_s4 = sadd.s32 (%p1170_p7), %s1010_s21, %s779_s8 }
  0x68   : > { %s780_s28 = sshll.u32 (%p1170_p7), %s431_s4, 2 }
 0x13a   : > { %v350_v6 = vpop.f32.mrb[0].mxu0 }
 0x13b   : > { %v351_v7 = vadd.f32 %v762_v5, %v350_v6  ;;  %v797_v8 = vpop.f32.mrb[1].mxu0 }
 0x13c   : > { %v353_v9 = vpop.f32.mrb[2].mxu0 }
 0x13d   : > { %v356_v10 = vpack.c.bf16 %v351_v7, %v351_v7  ;;  %v798_v11 = vpop.f32.mrb[3].mxu0 }
 0x13f   : > { %370 = vrot.lane.b32.xlu1 %v356_v10, %s1034_s27  ;;  %362 = vrot.lane.b32.xlu0 %v356_v10, %s1035_s30  ;;  %358 = vst.msk [vmem:[%s1246_s7] sm:$0xf] %vm357_vm2, %v356_v10  ;;  %s433_s30 = scalar_lea.vmem (%p1170_p7), %s1338_s3, %s780_s28 }
 0x143   : > { %375 = vrot.lane.b32.xlu1 %v356_v10, %s1036_s10  ;;  %366 = vrot.lane.b32.xlu0 %v356_v10, %s1037_s26 }
 0x146   : > { %v449_v23 = vld [vmem:[%s1246_s7] sm:$0xf] (%p1170_p7) }
 0x147   : > { %385 = vrot.lane.b32.xlu1 %v356_v10, %s1038_s13  ;;  %380 = vrot.lane.b32.xlu0 %v356_v10, %s1039_s14  ;;  %450 = vst [vmem:[%s433_s30] sm:$0xf] (%p1170_p7), %v449_v23 }
 0x14b   : > { %395 = vrot.lane.b32.xlu1 %v356_v10, %s1040_s11  ;;  %390 = vrot.lane.b32.xlu0 %v356_v10, %s1041_s15 }
 0x14f   : > { %405 = vrot.lane.b32.xlu1 %v356_v10, %s1042_s16  ;;  %400 = vrot.lane.b32.xlu0 %v356_v10, %s1043_s17 }
 0x153   : > { %410 = vrot.lane.b32.xlu0 %v356_v10, %s1044_s18 }
 0x1b1   : > { %v371_v12 = vpop.permute.xlu1 %370  ;;  %v363_v13 = vpop.permute.xlu0 %362 }
 0x1b2   : > { %767 = vst.msk [vmem:[%s1246_s7 + $0x4] sm:$0xf] %vm357_vm2, %v371_v12  ;;  %365 = vst.msk [vmem:[%s1253_s12] sm:$0xf] %vm357_vm2, %v363_v13 }
 0x1b5   : > { %v376_v14 = vpop.permute.xlu1 %375  ;;  %v367_v15 = vpop.permute.xlu0 %366 }
 0x1b6   : > { %768 = vst.msk [vmem:[%s1253_s12 + $0x4] sm:$0xf] %vm357_vm2, %v376_v14  ;;  %369 = vst.msk [vmem:[%s1260_s5] sm:$0xf] %vm357_vm2, %v367_v15 }
 0x1b9   : > { %v386_v16 = vpop.permute.xlu1 %385  ;;  %v381_v17 = vpop.permute.xlu0 %380  ;;  %v451_v24 = vld [vmem:[%s1246_s7 + $0x4] sm:$0xf] (%p1170_p7) }
 0x1ba   : > { %770 = vst.msk [vmem:[%s1246_s7 + $0x8] sm:$0xf] %vm357_vm2, %v386_v16  ;;  %769 = vst.msk [vmem:[%s1260_s5 + $0x4] sm:$0xf] %vm357_vm2, %v381_v17 }
 0x1bb   : > { %452 = vst [vmem:[%s433_s30 + $0x8] sm:$0xf] (%p1170_p7), %v451_v24 }
 0x1bd   : > { %v396_v18 = vpop.permute.xlu1 %395  ;;  %v391_v19 = vpop.permute.xlu0 %390 }
 0x1be   : > { %772 = vst.msk [vmem:[%s1260_s5 + $0x8] sm:$0xf] %vm357_vm2, %v396_v18  ;;  %771 = vst.msk [vmem:[%s1253_s12 + $0x8] sm:$0xf] %vm357_vm2, %v391_v19 }
 0x1c0   : > { %429 = sbr.rel (!%p1170_p7) target bundleno = 459 (0x1cb), region = 44 }
 0x1c1   : > { %v406_v20 = vpop.permute.xlu1 %405  ;;  %v401_v21 = vpop.permute.xlu0 %400  ;;  %v453_v25 = vld [vmem:[%s1246_s7 + $0x8] sm:$0xf] (%p1170_p7) }
 0x1c2   : > { %774 = vst.msk [vmem:[%s1253_s12 + $0xc] sm:$0xf] %vm357_vm2, %v406_v20  ;;  %773 = vst.msk [vmem:[%s1246_s7 + $0xc] sm:$0xf] %vm357_vm2, %v401_v21 }
 0x1c3   : > { %454 = vst [vmem:[%s433_s30 + $0x10] sm:$0xf] (%p1170_p7), %v453_v25 }
 0x1c5   : > { %v411_v22 = vpop.permute.xlu0 %410 }
 0x1c6   : > { %775 = vst.msk [vmem:[%s1260_s5 + $0xc] sm:$0xf] %vm357_vm2, %v411_v22 }
 0x1c9   : > { %v455_v26 = vld [vmem:[%s1246_s7 + $0xc] sm:$0xf] }
 0x1ca   : > { %456 = vst [vmem:[%s433_s30 + $0x18] sm:$0xf] %v455_v26 }
 0x1cb PF: > { %487 = sbr.rel (!%p1170_p7) target bundleno = 469 (0x1d5), region = 85  ;;  %s781_s7 = sshll.u32 (%p1170_p7), %s1014_s22, 3  ;;  %v507_v27 = vld [vmem:[%s1253_s12] sm:$0xf] (%p1170_p7)  ;;  %v509_v28 = vld [vmem:[%s1253_s12 + $0x4] sm:$0xf] (%p1170_p7) }
 0x1cc   : > { %s489_s10 = sadd.s32 (%p1170_p7), %s1010_s21, %s781_s7  ;;  %v511_v29 = vld [vmem:[%s1253_s12 + $0x8] sm:$0xf] (%p1170_p7)  ;;  %s1361_s11 = sld [smem:[#allocation13_spill]] (%p1170_p7) }
 0x1cd   : > { %v513_v30 = vld [vmem:[%s1253_s12 + $0xc] sm:$0xf] (%p1170_p7)  ;;  %s782_s26 = sshll.u32 (%p1170_p7), %s489_s10, 2 }
 0x1d2   : > { %s491_s15 = scalar_lea.vmem %s1361_s11, %s782_s26 }
 0x1d3   : > { %508 = vst [vmem:[%s491_s15] sm:$0xf] %v507_v27  ;;  %510 = vst [vmem:[%s491_s15 + $0x8] sm:$0xf] %v509_v28 }
 0x1d4   : > { %512 = vst [vmem:[%s491_s15 + $0x10] sm:$0xf] %v511_v29  ;;  %514 = vst [vmem:[%s491_s15 + $0x18] sm:$0xf] %v513_v30 }
 0x1d5 PF: > { %545 = sbr.rel (!%p1170_p7) target bundleno = 479 (0x1df), region = 126  ;;  %s783_s16 = sshll.u32 (%p1170_p7), %s1014_s22, 3  ;;  %v565_v31 = vld [vmem:[%s1260_s5] sm:$0xf] (%p1170_p7)  ;;  %v567_v32 = vld [vmem:[%s1260_s5 + $0x4] sm:$0xf] (%p1170_p7) }
 0x1d6   : > { %s547_s17 = sadd.s32 (%p1170_p7), %s1010_s21, %s783_s16  ;;  %v569_v33 = vld [vmem:[%s1260_s5 + $0x8] sm:$0xf] (%p1170_p7)  ;;  %v571_v34 = vld [vmem:[%s1260_s5 + $0xc] sm:$0xf] (%p1170_p7)  ;;  %s1362_s4 = sld [smem:[#allocation14_spill]] (%p1170_p7) }
 0x1d7   : > { %s784_s18 = sshll.u32 (%p1170_p7), %s547_s17, 2 }
 0x1dc   : > { %s549_s28 = scalar_lea.vmem %s1362_s4, %s784_s18 }
 0x1dd   : > { %566 = vst [vmem:[%s549_s28] sm:$0xf] %v565_v31  ;;  %568 = vst [vmem:[%s549_s28 + $0x8] sm:$0xf] %v567_v32 }
 0x1de   : > { %570 = vst [vmem:[%s549_s28 + $0x10] sm:$0xf] %v569_v33  ;;  %572 = vst [vmem:[%s549_s28 + $0x18] sm:$0xf] %v571_v34 }
 0x1df PF: > { %s20_s25 = sadd.s32 1, %s1026_s25   ;;  %s1363_s6 = sld [smem:[#allocation11_spill]] }
 0x1e0   : > { %p17_p7 = scmp.ge.s32.totalorder %s20_s25, 6   ;;  %s1364_s18 = smov %s1002_s19 }
 0x1e1   : > { %s1365_s19 = smov %s1006_s20  ;;  %s1366_s20 = smov %s1187_s1 }
 0x1e2   : > { %s1367_s21 = smov %s1018_s23  ;;  %s1368_s22 = smov %s1022_s24 }
 0x1e3   : > { %s1370_s24 = smov %s1376_s9  ;;  %19 = sbr.rel (!%p17_p7) target bundleno = 10 (0xa), region = 232 }
 0x1e5   : > { %s1369_s23 = smov %s1363_s6 }
 0x1ea   :  { %627 = vsyncpa [#allocation3], 1 }
 0x1eb   :  { %629 = vsyncpa [#allocation3 + $0x1], 1 }
 0x1ec   :  { %630 = vsyncpa [#allocation5], 1 }

</bundles_post_ra>
